<compile_context>
chip_gen: v7x
topology: tpu7x:2x2x1
jax: 0.10.0
libtpu: 0.0.40
codegen_flags: <defaults>
</compile_context>

<pallas_src>
import functools

import jax
import jax.numpy as jnp
from jax.experimental import pallas as pl
from jax.experimental.pallas import tpu as pltpu

LANE = 128          # MXU/lane width used for padded weights
H1, H2 = 4, 8       # hidden widths of the MLP


def _round_up(n, m):
    return ((n + m - 1) // m) * m


def dnn_kernel(x_ref, p_ref, o_ref, *, f_pad, w_out):
    # Parameter slab layout (rows):
    #   [0,              f_pad)            -> w1  ([f_pad, 128], cols 0..3 live)
    #   [f_pad,          f_pad + 128)      -> w2  (rows 0..3, cols 0..7 live)
    #   [f_pad + 128,    f_pad + 256)      -> w3  (rows 0..7, cols 0..n_actions live)
    #   [f_pad + 256,    f_pad + 264)      -> biases: row 0 = b1, 1 = b2, 2 = b3
    x = x_ref[...]                                     # [TB, f_pad] f32

    w1 = p_ref[pl.ds(0, f_pad), :]                     # [f_pad, 128]
    w2 = p_ref[pl.ds(f_pad, LANE), :]                  # [128, 128]
    w3 = p_ref[pl.ds(f_pad + LANE, LANE), :]           # [128, 128]
    bias = p_ref[pl.ds(f_pad + 2 * LANE, 8), :]        # [8, 128]
    b1 = bias[0:1, :]
    b2 = bias[1:2, :]
    b3 = bias[2:3, :]

    # All three contractions on the MXU, f32 accumulation.  Padded lanes/rows of
    # the slab are exactly zero, so padded lanes of h1/h2 stay exactly zero.
    h1 = jnp.maximum(jnp.dot(x, w1, preferred_element_type=jnp.float32) + b1, 0.0)
    h2 = jnp.maximum(jnp.dot(h1, w2, preferred_element_type=jnp.float32) + b2, 0.0)
    y = jnp.dot(h2, w3, preferred_element_type=jnp.float32) + b3

    # Narrow store: only the (padded) n_actions lanes go back to HBM.
    o_ref[...] = y[:, :w_out].astype(o_ref.dtype)


def pack_params(params, n_features):
    """Pack w1,b1,w2,b2,w3,b3 (w: [in,out], b: [out]) into one padded f32 slab."""
    n_actions = params["w3"].shape[1]
    f_pad = max(8, _round_up(n_features, 8))
    slab = jnp.zeros((f_pad + 2 * LANE + 8, LANE), jnp.float32)
    slab = slab.at[:n_features, :H1].set(params["w1"])
    slab = slab.at[f_pad:f_pad + H1, :H2].set(params["w2"])
    slab = slab.at[f_pad + LANE:f_pad + LANE + H2, :n_actions].set(params["w3"])
    slab = slab.at[f_pad + 2 * LANE + 0, :H1].set(params["b1"])
    slab = slab.at[f_pad + 2 * LANE + 1, :H2].set(params["b2"])
    slab = slab.at[f_pad + 2 * LANE + 2, :n_actions].set(params["b3"])
    return slab


def _choose_tiling(batch, f_pad, w_out):
    """Pick (tb, b_pad, n_tiles): big tiles, >=2 grid steps when possible."""
    b8 = max(8, _round_up(batch, 8))
    # Keep double-buffered x/out blocks inside a comfortable VMEM budget.
    per_row_bytes = 4 * (f_pad + w_out) * 2
    tb_vmem = max(8, ((16 * 1024 * 1024) // per_row_bytes) // 8 * 8)
    tb_cap = min(2048, tb_vmem)
    # At least 2 grid steps when the batch allows, so v7x's 2 TCs both work.
    n_tiles = max(pl.cdiv(b8, tb_cap), 2 if b8 >= 16 else 1)
    tb = max(8, _round_up(pl.cdiv(b8, n_tiles), 8))
    b_pad = n_tiles * tb          # at most 8 wasted rows per tile
    return tb, b_pad, n_tiles


@functools.partial(jax.jit, static_argnames=("n_actions",))
def dnn_forward(x, slab, n_actions):
    """x: [B, n_features] float32. slab: packed params. Returns [B, n_actions]."""
    B, n_features = x.shape
    f_pad = slab.shape[0] - 2 * LANE - 8
    w_out = max(8, _round_up(n_actions, 8))

    tb, b_pad, n_tiles = _choose_tiling(B, f_pad, w_out)

    # Skip the wrapper-side pad copy entirely when shapes already line up.
    if B != b_pad or n_features != f_pad:
        x_in = jnp.zeros((b_pad, f_pad), jnp.float32)
        x_in = x_in.at[:B, :n_features].set(x.astype(jnp.float32))
    else:
        x_in = x.astype(jnp.float32)

    kernel = functools.partial(dnn_kernel, f_pad=f_pad, w_out=w_out)

    flops = 2 * b_pad * (f_pad * LANE + LANE * LANE + LANE * LANE)
    bytes_accessed = x_in.size * 4 + slab.size * 4 + b_pad * w_out * 4

    out_p = pl.pallas_call(
        kernel,
        out_shape=jax.ShapeDtypeStruct((b_pad, w_out), jnp.float32),
        grid=(n_tiles,),
        in_specs=[
            pl.BlockSpec((tb, f_pad), lambda i: (i, 0)),       # batch-tiled x
            pl.BlockSpec(slab.shape, lambda i: (0, 0)),        # params: resident
        ],
        out_specs=pl.BlockSpec((tb, w_out), lambda i: (i, 0)),  # narrow output
        compiler_params=pltpu.CompilerParams(
            dimension_semantics=("parallel",),
            vmem_limit_bytes=32 * 1024 * 1024),
        cost_estimate=pl.CostEstimate(
            flops=flops, transcendentals=0, bytes_accessed=bytes_accessed),
    )(x_in, slab)

    if B != b_pad or n_actions != w_out:
        return out_p[:B, :n_actions]
    return out_p


def init_params(key, n_features, n_actions):
    """Kaiming-normal (fan_in, gain=sqrt(2)) weights, zero biases — matches
    nn.init.kaiming_normal_ on nn.Linear weights. Weights stored as [in, out]
    (transpose of PyTorch's [out, in]) so the kernel computes y = x @ W + b."""
    k1, k2, k3 = jax.random.split(key, 3)

    def kaiming(k, fan_in, fan_out):
        std = (2.0 / fan_in) ** 0.5
        return (jax.random.normal(k, (fan_out, fan_in), jnp.float32) * std).T

    return {
        "w1": kaiming(k1, n_features, H1),
        "b1": jnp.zeros((H1,), jnp.float32),
        "w2": kaiming(k2, H1, H2),
        "b2": jnp.zeros((H2,), jnp.float32),
        "w3": kaiming(k3, H2, n_actions),
        "b3": jnp.zeros((n_actions,), jnp.float32),
    }


def dnn_reference(x, p):
    h1 = jnp.maximum(x @ p["w1"] + p["b1"], 0.0)
    h2 = jnp.maximum(h1 @ p["w2"] + p["b2"], 0.0)
    return h2 @ p["w3"] + p["b3"]


if __name__ == "__main__":
    key = jax.random.PRNGKey(0)

    # Case 1: aligned shapes (exercises the zero-copy input path, grid=(1,)).
    n_features, n_actions, batch = 16, 4, 8
    k_param, k_x, key = jax.random.split(key, 3)
    params = init_params(k_param, n_features, n_actions)
    slab = pack_params(params, n_features)
    x = jax.random.normal(k_x, (batch, n_features), jnp.float32)
    out = jax.block_until_ready(dnn_forward(x, slab, n_actions))
    ref = dnn_reference(x, params)
    assert out.shape == (batch, n_actions)
    assert jnp.allclose(out, ref, atol=1e-5, rtol=1e-5), "mismatch (aligned case)"

    # Case 2: ragged shapes (exercises pad path, narrow output, 2 grid steps).
    n_features2, n_actions2, batch2 = 10, 3, 50
    k_param2, k_x2, key = jax.random.split(key, 3)
    params2 = init_params(k_param2, n_features2, n_actions2)
    slab2 = pack_params(params2, n_features2)
    x2 = jax.random.normal(k_x2, (batch2, n_features2), jnp.float32)
    out2 = jax.block_until_ready(dnn_forward(x2, slab2, n_actions2))
    ref2 = dnn_reference(x2, params2)
    assert out2.shape == (batch2, n_actions2)
    assert jnp.allclose(out2, ref2, atol=1e-5, rtol=1e-5), "mismatch (ragged case)"

    print("KERNEL_OK")
</pallas_src>

<mosaic_0001>
module attributes {stable_mosaic.version = 11 : i64} {
  func.func @dnn_kernel(%arg0: i32, %arg1: memref<8x16xf32, #tpu.memory_space<vmem>>, %arg2: memref<280x128xf32, #tpu.memory_space<vmem>>, %arg3: memref<8x8xf32, #tpu.memory_space<vmem>>) attributes {dimension_semantics = [#tpu.dimension_semantics<parallel>], iteration_bounds = array<i64: 1>, scalar_prefetch = 0 : i64, scratch_operands = 0 : i64, tpu.core_type = #tpu.core_type<tc>, window_params = [{transform_indices = @transform_0, window_bounds = array<i64: 8, 16>}, {pipeline_mode = #tpu.pipeline_mode<synchronous>, transform_indices = @transform_1, window_bounds = array<i64: 280, 128>}, {transform_indices = @transform_2, window_bounds = array<i64: 8, 8>}]} {
    %c0 = arith.constant 0 : index
    %c0_0 = arith.constant 0 : index
    %0 = vector.load %arg1[%c0, %c0_0] : memref<8x16xf32, #tpu.memory_space<vmem>>, vector<8x16xf32>
    %c0_1 = arith.constant 0 : index
    %c0_2 = arith.constant 0 : index
    %1 = vector.load %arg2[%c0_1, %c0_2] : memref<280x128xf32, #tpu.memory_space<vmem>>, vector<16x128xf32>
    %c16 = arith.constant 16 : index
    %c0_3 = arith.constant 0 : index
    %2 = vector.load %arg2[%c16, %c0_3] : memref<280x128xf32, #tpu.memory_space<vmem>>, vector<128x128xf32>
    %c144 = arith.constant 144 : index
    %c0_4 = arith.constant 0 : index
    %3 = vector.load %arg2[%c144, %c0_4] : memref<280x128xf32, #tpu.memory_space<vmem>>, vector<128x128xf32>
    %c272 = arith.constant 272 : index
    %c0_5 = arith.constant 0 : index
    %4 = vector.load %arg2[%c272, %c0_5] : memref<280x128xf32, #tpu.memory_space<vmem>>, vector<8x128xf32>
    %5 = vector.extract_strided_slice %4 {offsets = [0, 0], sizes = [1, 128], strides = [1, 1]} : vector<8x128xf32> to vector<1x128xf32>
    %6 = vector.extract_strided_slice %4 {offsets = [1, 0], sizes = [1, 128], strides = [1, 1]} : vector<8x128xf32> to vector<1x128xf32>
    %7 = vector.extract_strided_slice %4 {offsets = [2, 0], sizes = [1, 128], strides = [1, 1]} : vector<8x128xf32> to vector<1x128xf32>
    %cst = arith.constant dense<0.000000e+00> : vector<8x128xf32>
    %8 = tpu.matmul %0, %1, %cst {dimension_numbers = #tpu.dot_dimension_numbers<[1], [0], [0], [1], [0, 0, 1, 1], [], []>} : vector<8x16xf32>, vector<16x128xf32>, vector<8x128xf32> -> vector<8x128xf32>
    %9 = vector.broadcast %5 : vector<1x128xf32> to vector<8x128xf32>
    %10 = arith.addf %8, %9 : vector<8x128xf32>
    %cst_6 = arith.constant 0.000000e+00 : f32
    %11 = vector.broadcast %cst_6 : f32 to vector<8x128xf32>
    %12 = arith.maximumf %10, %11 : vector<8x128xf32>
    %cst_7 = arith.constant dense<0.000000e+00> : vector<8x128xf32>
    %13 = tpu.matmul %12, %2, %cst_7 {dimension_numbers = #tpu.dot_dimension_numbers<[1], [0], [0], [1], [0, 0, 1, 1], [], []>} : vector<8x128xf32>, vector<128x128xf32>, vector<8x128xf32> -> vector<8x128xf32>
    %14 = vector.broadcast %6 : vector<1x128xf32> to vector<8x128xf32>
    %15 = arith.addf %13, %14 : vector<8x128xf32>
    %cst_8 = arith.constant 0.000000e+00 : f32
    %16 = vector.broadcast %cst_8 : f32 to vector<8x128xf32>
    %17 = arith.maximumf %15, %16 : vector<8x128xf32>
    %cst_9 = arith.constant dense<0.000000e+00> : vector<8x128xf32>
    %18 = tpu.matmul %17, %3, %cst_9 {dimension_numbers = #tpu.dot_dimension_numbers<[1], [0], [0], [1], [0, 0, 1, 1], [], []>} : vector<8x128xf32>, vector<128x128xf32>, vector<8x128xf32> -> vector<8x128xf32>
    %19 = vector.broadcast %7 : vector<1x128xf32> to vector<8x128xf32>
    %20 = arith.addf %18, %19 : vector<8x128xf32>
    %21 = vector.extract_strided_slice %20 {offsets = [0, 0], sizes = [8, 8], strides = [1, 1]} : vector<8x128xf32> to vector<8x8xf32>
    %c0_10 = arith.constant 0 : index
    %c0_11 = arith.constant 0 : index
    %22 = vector.load %arg3[%c0_10, %c0_11] : memref<8x8xf32, #tpu.memory_space<vmem>>, vector<8x8xf32>
    tpu.vector_store %arg3[%c0_10, %c0_11], %21 {strides = array<i32>} : memref<8x8xf32, #tpu.memory_space<vmem>>, vector<8x8xf32>,
    return
  }
  func.func @transform_0(%arg0: i32) -> (i32, i32) {
    %c0_i32 = arith.constant 0 : i32
    %c0_i32_0 = arith.constant 0 : i32
    return %arg0, %c0_i32 : i32, i32
  }
  func.func @transform_1(%arg0: i32) -> (i32, i32) {
    %c0_i32 = arith.constant 0 : i32
    %c0_i32_0 = arith.constant 0 : i32
    %c0_i32_1 = arith.constant 0 : i32
    return %c0_i32, %c0_i32_0 : i32, i32
  }
  func.func @transform_2(%arg0: i32) -> (i32, i32) {
    %c0_i32 = arith.constant 0 : i32
    %c0_i32_0 = arith.constant 0 : i32
    return %arg0, %c0_i32 : i32, i32
  }
}

</mosaic_0001>

<bundles_post_ra>
// kernel: dnn_forward.1
= control target key start
LH: loop header
LB: loop body
LE: loop exit
PB: predicated region body
PF: predicated region fallthrough
CT: control target
= control target key end

     0   :  { %7 = vsyncpa [#allocation3], 0  ;;  %s606_s0 = inlined_call_operand.hbm [shape: f32[8,16], index: 0, kind: input, shape index: {}]   ;;  %s607_s1 = inlined_call_operand.hbm [shape: f32[280,128], index: 1, kind: input, shape index: {}]   ;;  %s608_s2 = inlined_call_operand.vmem [shape: f32[8,8], index: 2, kind: output, shape index: {}]  }
   0x1   :  { %8 = vsyncpa [#allocation5], 0  ;;  %s530_s9 = smov [#allocation2]   ;;  %s531_s11 = smov [#allocation4]  }
   0x2   :  { %s15_s10 = sshll.u32 %s530_s9, 4  ;;  %s24_s12 = sshll.u32 %s531_s11, 4  ;;  %s16_s10 = int_to_ptr.vmem [resolvable:$true] %s15_s10  ;;  %s552_s12 = int_to_ptr.vmem [resolvable:$true] %s24_s12 }
   0x3   :  { %s482_s15 = scalar_lea.hbm %s606_s0, 128 }
   0x4   :  { %p483_p0 = scmp.ne.s32.totalorder %s606_s0, %s482_s15  ;;  %p486_p1 = scmp.lt.u32.totalorder %s482_s15, %s606_s0 }
   0x6   :  { %p488_p2 = pnand %p486_p1, %p483_p0 }
   0x8   :  { %491 = shalt.err (!%p488_p2)
}
   0x9   :  { %s492_s20 = scalar_lea.vmem %s16_s10, 128  ;;  %p497_p4 = scmp.lt.s32.totalorder %s16_s10, %s16_s10 }
   0xa   :  { %p493_p3 = scmp.ne.s32.totalorder %s16_s10, %s492_s20  ;;  %p498_p5 = scmp.lt.s32.totalorder %s492_s20, %s492_s20 }
   0xc   :  { %p499_p6 = por %p498_p5, %p497_p4 }
   0xe   :  { %p500_p7 = pnand %p499_p6, %p493_p3 }
  0x10   :  { %503 = shalt.err (!%p500_p7)
}
  0x11   :  { %18 = dma.hbm_to_vmem [thread:$0]  %s606_s0, 128, %s16_s10, [#allocation3]  }
  0x12   :  { %s504_s25 = scalar_lea.hbm %s607_s1, 4480 }
  0x13   :  { %p505_p8 = scmp.ne.s32.totalorder %s607_s1, %s504_s25  ;;  %p508_p9 = scmp.lt.u32.totalorder %s504_s25, %s607_s1 }
  0x15   :  { %p510_p10 = pnand %p508_p9, %p505_p8 }
  0x17   :  { %513 = shalt.err (!%p510_p10)
}
  0x18   :  { %s514_s30 = scalar_lea.vmem %s552_s12, 4480  ;;  %p519_p12 = scmp.lt.s32.totalorder %s552_s12, %s552_s12 }
  0x19   :  { %p515_p11 = scmp.ne.s32.totalorder %s552_s12, %s514_s30  ;;  %p520_p13 = scmp.lt.s32.totalorder %s514_s30, %s514_s30 }
  0x1b   :  { %p521_p0 = por %p520_p13, %p519_p12 }
  0x1d   :  { %p522_p1 = pnand %p521_p0, %p515_p11 }
  0x1f   :  { %525 = shalt.err (!%p522_p1)
}
  0x20   :  { %s532_s0 = smov 128   ;;  %s533_s3 = smov 8  }
  0x21   :  { %30 = dma.hbm_to_vmem [thread:$0]  %s607_s1, 4480, %s552_s12, [#allocation5], %s532_s0, %s532_s0, %s533_s3  }
  0x22   :  { %526 = dma.done.wait [#allocation3], 128  }
  0x23   :  { %527 = vsyncadd [#allocation3], 4294967168 }
  0x24   :  { %528 = dma.done.wait [#allocation5], 4480  }
  0x25   :  { %529 = vsyncadd [#allocation5], 4294962816  ;;  %v534_v0 = vmov 0.0|0.0   ;;  %vm535_vm0 = vmmov 0   ;;  %v536_v1 = vmov 0.0   ;;  %v38_v2 = vld [vmem:[#allocation4] sm:$0xff]  ;;  %v73_v51 = vlaneseq }
  0x26   :  { %424 = vmatprep.subr.bf16.mxu0 %v534_v0  ;;  %351 = vmatprep.mubr.msk.f32.mxu0 %vm535_vm0, %v536_v1  ;;  %v39_v3 = vld [vmem:[#allocation4 + $0x8] sm:$0xff]  ;;  %v40_v5 = vld [vmem:[#allocation4 + $0x10] sm:$0xff]  ;;  %v41_v6 = vld [vmem:[#allocation4 + $0x18] sm:$0xff]  ;;  %vm77_vm1 = vcmask 130048   ;;  %vm301_vm2 = vcmask 64512  }
  0x27   :  { %427 = vmatprep.subr.bf16.mxu1 %v534_v0  ;;  %386 = vmatprep.mubr.msk.f32.mxu1 %vm535_vm0, %v536_v1  ;;  %v425_v4 = vpack.c.bf16 %v39_v3, %v38_v2  ;;  %v42_v7 = vld [vmem:[#allocation4 + $0x20] sm:$0xff]  ;;  %v428_v8 = vpack.c.bf16 %v41_v6, %v40_v5  ;;  %v43_v9 = vld [vmem:[#allocation4 + $0x28] sm:$0xff]  ;;  %v37_v10 = vld [vmem:[#allocation2] sm:$0xff]  ;;  %v74_v52 = vshrl.u32 %v73_v51, 7 }
  0x28   :  { %v431_v11 = vpack.c.bf16 %v43_v9, %v42_v7  ;;  %v44_v12 = vld [vmem:[#allocation4 + $0x30] sm:$0xff]  ;;  %v45_v13 = vld [vmem:[#allocation4 + $0x38] sm:$0xff]  ;;  %v46_v15 = vld [vmem:[#allocation4 + $0x40] sm:$0xff] }
  0x29   :  { %426 = vmatpush3.bf16.msra.mxu0 %v425_v4  ;;  %429 = vmatpush3.bf16.msra.mxu1 %v428_v8  ;;  %v434_v14 = vpack.c.bf16 %v45_v13, %v44_v12  ;;  %v47_v16 = vld [vmem:[#allocation4 + $0x48] sm:$0xff]  ;;  %v48_v18 = vld [vmem:[#allocation4 + $0x50] sm:$0xff]  ;;  %v49_v19 = vld [vmem:[#allocation4 + $0x58] sm:$0xff]  ;;  %v75_v53 = vsub.s32 0, %v74_v52  ;;  %v154_v63 = vsub.s32 1, %v74_v52  ;;  %v229_v5 = vsub.s32 2, %v74_v52 }
  0x2a   :  { %451 = vmatprep.subr.bf16.mxu0 %v534_v0  ;;  %430 = vmatprep.subr.bf16.mxu1 %v534_v0  ;;  %v437_v17 = vpack.c.bf16 %v47_v16, %v46_v15  ;;  %v440_v20 = vpack.c.bf16 %v49_v19, %v48_v18  ;;  %v50_v21 = vld [vmem:[#allocation4 + $0x60] sm:$0xff]  ;;  %v51_v22 = vld [vmem:[#allocation4 + $0x68] sm:$0xff]  ;;  %v52_v24 = vld [vmem:[#allocation4 + $0x70] sm:$0xff] }
  0x2b   :  { %v443_v23 = vpack.c.bf16 %v51_v22, %v50_v21  ;;  %v53_v25 = vld [vmem:[#allocation4 + $0x78] sm:$0xff]  ;;  %v54_v27 = vld [vmem:[#allocation4 + $0x80] sm:$0xff]  ;;  %v55_v28 = vld [vmem:[#allocation4 + $0x88] sm:$0xff] }
  0x2c   :  { %352 = vmatmul.mubr.msk.f32.vlgmr.msra.gmra.mrb[0].mxu0 %vm77_vm1, %v37_v10  ;;  %v446_v26 = vpack.c.bf16 %v53_v25, %v52_v24  ;;  %v449_v29 = vpack.c.bf16 %v55_v28, %v54_v27  ;;  %v56_v30 = vld [vmem:[#allocation4 + $0x90] sm:$0xff]  ;;  %v57_v31 = vld [vmem:[#allocation4 + $0x98] sm:$0xff]  ;;  %v58_v32 = vld [vmem:[#allocation4 + $0xa0] sm:$0xff] }
  0x2d   :  { %421 = vmatprep.mubr.msk.f32.mxu0 %vm535_vm0, %v536_v1  ;;  %432 = vmatpush3.bf16.msra.mxu1 %v431_v11  ;;  %v452_v33 = vpack.c.bf16 %v57_v31, %v56_v30  ;;  %v59_v34 = vld [vmem:[#allocation4 + $0xa8] sm:$0xff]  ;;  %v60_v36 = vld [vmem:[#allocation4 + $0xb0] sm:$0xff]  ;;  %v61_v37 = vld [vmem:[#allocation4 + $0xb8] sm:$0xff] }
  0x2e   :  { %433 = vmatprep.subr.bf16.mxu1 %v534_v0  ;;  %v455_v35 = vpack.c.bf16 %v59_v34, %v58_v32  ;;  %v458_v38 = vpack.c.bf16 %v61_v37, %v60_v36  ;;  %v62_v39 = vld [vmem:[#allocation4 + $0xc0] sm:$0xff]  ;;  %v63_v40 = vld [vmem:[#allocation4 + $0xc8] sm:$0xff]  ;;  %v64_v42 = vld [vmem:[#allocation4 + $0xd0] sm:$0xff] }
  0x2f   :  { %453 = vmatpush3.bf16.msra.mxu0 %v452_v33  ;;  %v461_v41 = vpack.c.bf16 %v63_v40, %v62_v39  ;;  %v65_v43 = vld [vmem:[#allocation4 + $0xd8] sm:$0xff]  ;;  %v66_v45 = vld [vmem:[#allocation4 + $0xe0] sm:$0xff]  ;;  %v67_v46 = vld [vmem:[#allocation4 + $0xe8] sm:$0xff] }
  0x30   :  { %454 = vmatprep.subr.bf16.mxu0 %v534_v0  ;;  %v464_v44 = vpack.c.bf16 %v65_v43, %v64_v42  ;;  %v467_v47 = vpack.c.bf16 %v67_v46, %v66_v45  ;;  %v68_v48 = vld [vmem:[#allocation4 + $0xf0] sm:$0xff]  ;;  %v69_v49 = vld [vmem:[#allocation4 + $0xf8] sm:$0xff]  ;;  %v70_v60 = vld [vmem:[#allocation4 + $0x100] sm:$0xff] }
  0x31   :  { %435 = vmatpush3.bf16.msra.mxu1 %v434_v14  ;;  %v470_v50 = vpack.c.bf16 %v69_v49, %v68_v48  ;;  %v72_v54 = vld [vmem:[#allocation4 + $0x110] sm:$0xff]  ;;  %v71_v61 = vld [vmem:[#allocation4 + $0x108] sm:$0xff] }
  0x32   :  { %436 = vmatprep.subr.bf16.mxu1 %v534_v0  ;;  %v76_v55 = vrot.slane %v72_v54, %v75_v53  ;;  %v473_v62 = vpack.c.bf16 %v71_v61, %v70_v60  ;;  %v155_v1 = vrot.slane %v72_v54, %v154_v63  ;;  %v230_v6 = vrot.slane %v72_v54, %v229_v5 }
  0x33   :  { %456 = vmatpush3.bf16.msra.mxu0 %v455_v35 }
  0x34   :  { %457 = vmatprep.subr.bf16.mxu0 %v534_v0 }
  0x35   :  { %438 = vmatpush3.bf16.msra.mxu1 %v437_v17 }
  0x36   :  { %439 = vmatprep.subr.bf16.mxu1 %v534_v0 }
  0x37   :  { %459 = vmatpush3.bf16.msra.mxu0 %v458_v38 }
  0x38   :  { %460 = vmatprep.subr.bf16.mxu0 %v534_v0 }
  0x39   :  { %441 = vmatpush3.bf16.msra.mxu1 %v440_v20 }
  0x3a   :  { %442 = vmatprep.subr.bf16.mxu1 %v534_v0 }
  0x3b   :  { %462 = vmatpush3.bf16.msra.mxu0 %v461_v41 }
  0x3c   :  { %463 = vmatprep.subr.bf16.mxu0 %v534_v0 }
  0x3d   :  { %444 = vmatpush3.bf16.msra.mxu1 %v443_v23 }
  0x3e   :  { %445 = vmatprep.subr.bf16.mxu1 %v534_v0 }
  0x3f   :  { %465 = vmatpush3.bf16.msra.mxu0 %v464_v44 }
  0x40   :  { %466 = vmatprep.subr.bf16.mxu0 %v534_v0 }
  0x41   :  { %447 = vmatpush3.bf16.msra.mxu1 %v446_v26 }
  0x42   :  { %448 = vmatprep.subr.bf16.mxu1 %v534_v0 }
  0x43   :  { %468 = vmatpush3.bf16.msra.mxu0 %v467_v47 }
  0x44   :  { %469 = vmatprep.subr.bf16.mxu0 %v534_v0 }
  0x45   :  { %450 = vmatpush3.bf16.msra.mxu1 %v449_v29 }
  0x47   :  { %471 = vmatpush3.bf16.msra.mxu0 %v470_v50 }
  0x48   :  { %472 = vmatprep.subr.bf16.mxu0 %v534_v0 }
  0x4b   :  { %474 = vmatpush3.bf16.msra.mxu0 %v473_v62 }
  0xff   :  { %v147_v56 = vpop.f32.mrb[0].mxu0 }
 0x100   :  { %v148_v57 = vadd.f32 %v147_v56, %v76_v55  ;;  %v353_v58 = vpop.f32.mrb[1].mxu0 }
 0x102   :  { %v151_v59 = vmax.f32 %v148_v57, 0.0 }
 0x104   :  { %387 = vmatmul.mubr.f32.vlgmr.msra.gmra.mrb[0].mxu1 %v151_v59 }
 0x1d7   :  { %v222_v2 = vpop.f32.mrb[0].mxu1 }
 0x1d8   :  { %v223_v3 = vadd.f32 %v222_v2, %v155_v1  ;;  %v388_v4 = vpop.f32.mrb[1].mxu1 }
 0x1da   :  { %v226_v0 = vmax.f32 %v223_v3, 0.0 }
 0x1dc   :  { %422 = vmatmul.mubr.f32.vlgmr.msra.gmra.mrb[2].mxu0 %v226_v0 }
 0x2af   :  { %v297_v7 = vpop.f32.mrb[2].mxu0 }
 0x2b0   :  { %v298_v8 = vadd.f32 %v297_v7, %v230_v6  ;;  %v423_v9 = vpop.f32.mrb[3].mxu0 }
 0x2b2   :  { %302 = vst.msk [vmem:[%s608_s2] sm:$0xff] %vm301_vm2, %v298_v8 }
 0x2b3   :  { %307 = vsyncpa [#allocation3], 1 }
 0x2b4   :  { %308 = vsyncpa [#allocation5], 1 }

</bundles_post_ra>
